<compile_context>
chip_gen: v7x
topology: tpu7x:2x2x1
jax: 0.10.0
libtpu: 0.0.40
codegen_flags: <defaults>
</compile_context>

<pallas_src>
import jax
import jax.numpy as jnp
from jax.experimental import pallas as pl
from jax.experimental.pallas import tpu as pltpu

_LANE = 128


def _round_up(a, b):
    return (a + b - 1) // b * b


def _cdiv(a, b):
    return -(-a // b)


def _vmem_params():
    """Per-generation scoped-VMEM limit and per-step working-set budget."""
    cap = 64 * 1024 * 1024                     # conservative default (v7x physical)
    try:
        info = pltpu.get_tpu_info()
        cap = int(getattr(info, "vmem_capacity_bytes", cap)) or cap
    except Exception:
        pass
    # 48 MiB on 64 MiB parts (v7x), ~96 MiB on 128 MiB parts (v5e/v6e)
    limit = min(cap * 3 // 4, 100 * 1024 * 1024)
    budget = limit // 2                        # headroom for temps + double buffers
    return int(limit), int(budget)


def _choose_feature_tile(m):
    """m = number of 128-lane units in the feature axis.

    Returns (ts, m_pad): the sublane tile (second-to-last block dim) and the
    padded feature-unit count.  ts is a multiple of 8 (full vreg sublane
    occupancy) or the full extent (always legal).
    """
    if m < 16:
        return m, m                            # one feature step, full extent
    m8 = _round_up(m, 8)
    ts_cap = min(64, m8 // 2)                  # >=2 feature steps: megacore + pipeline
    ts_cap = max(8, ts_cap - ts_cap % 8)
    for d in range(ts_cap, 7, -8):
        if m8 % d == 0:
            return d, m8
    return 8, m8                               # 8 always divides m8


def _choose_batch_tile(n, ts, feat_steps, per_elem_bytes, budget):
    """Tile the batch axis so the VMEM footprint is independent of N."""
    row_bytes = ts * _LANE * per_elem_bytes
    tn_cap = max(1, budget // row_bytes)
    # Aim for >=4 total grid steps (>=2 per v7x TensorCore) when N allows it,
    # so the BlockSpec double-buffer overlaps DMA with compute.
    want_batch_steps = max(1, _cdiv(4, feat_steps))
    if n > want_batch_steps:
        tn_cap = min(tn_cap, max(1, _cdiv(n, want_batch_steps)))
    tn_cap = max(1, min(tn_cap, n))
    best = None
    for d in range(tn_cap, 0, -1):             # prefer a divisor of n: no pad copy
        if n % d == 0:
            best = d
            break
    if best is not None and best * 2 >= tn_cap:
        return best, n
    return tn_cap, _round_up(n, tn_cap)


def _pad_to_3d(x2d, n_pad, f_pad):
    n, f = x2d.shape
    if n_pad != n or f_pad != f:
        x2d = jnp.pad(x2d, ((0, n_pad - n), (0, f_pad - f)))
    return x2d.reshape(n_pad, f_pad // _LANE, _LANE)


def _train_kernel(x_ref, y_ref, s_ref, q_ref):
    # Zero-init the resident per-feature accumulators on the first batch step.
    @pl.when(pl.program_id(1) == 0)
    def _():
        s_ref[...] = jnp.zeros_like(s_ref)
        q_ref[...] = jnp.zeros_like(q_ref)

    yf = jnp.maximum(x_ref[...].astype(jnp.float32), 0.0)   # f = ReLU, f32 stats
    y_ref[...] = yf.astype(y_ref.dtype)
    s_ref[...] += jnp.sum(yf, axis=0)                        # sum over batch tile
    q_ref[...] += jnp.sum(yf * yf, axis=0)                   # sum of squares


def _eval_kernel(x_ref, clip_ref, y_ref):
    # torch.clip(relu(x), max=clip): upper clamp only, computed in input dtype.
    y = jnp.maximum(x_ref[...], 0.0)
    y_ref[...] = jnp.minimum(y, clip_ref[...][None, :, :]).astype(y_ref.dtype)


def robust_activation_train(x2d):
    n, f = x2d.shape
    itemsize = jnp.dtype(x2d.dtype).itemsize
    m = _cdiv(f, _LANE)
    ts, m_pad = _choose_feature_tile(m)
    feat_steps = m_pad // ts
    limit, budget = _vmem_params()
    # x + y double-buffered in input dtype, plus full-block f32 temporaries
    per_elem = 4 * itemsize + 8
    tn, n_pad = _choose_batch_tile(n, ts, feat_steps, per_elem, budget)
    batch_steps = n_pad // tn
    f_pad = m_pad * _LANE
    # zero padding is neutral: relu(0) = 0 contributes nothing to s and q
    x3 = _pad_to_3d(x2d, n_pad, f_pad)

    y3, s2, q2 = pl.pallas_call(
        _train_kernel,
        out_shape=(
            jax.ShapeDtypeStruct((n_pad, m_pad, _LANE), x2d.dtype),
            jax.ShapeDtypeStruct((m_pad, _LANE), jnp.float32),
            jax.ShapeDtypeStruct((m_pad, _LANE), jnp.float32),
        ),
        grid_spec=pltpu.PrefetchScalarGridSpec(
            num_scalar_prefetch=0,
            grid=(feat_steps, batch_steps),             # reduction (batch) axis last
            in_specs=[pl.BlockSpec((tn, ts, _LANE), lambda j, b: (b, j, 0))],
            out_specs=[
                pl.BlockSpec((tn, ts, _LANE), lambda j, b: (b, j, 0)),
                pl.BlockSpec((ts, _LANE), lambda j, b: (j, 0)),   # resident over b
                pl.BlockSpec((ts, _LANE), lambda j, b: (j, 0)),   # resident over b
            ],
        ),
        compiler_params=pltpu.CompilerParams(
            dimension_semantics=("parallel", "arbitrary"),
            vmem_limit_bytes=limit),
    )(x3)

    y = y3.reshape(n_pad, f_pad)[:n, :f]
    s = s2.reshape(1, f_pad)[:, :f]
    q = q2.reshape(1, f_pad)[:, :f]
    return y, s, q


def robust_activation_eval(x2d, clip2d):
    n, f = x2d.shape
    itemsize = jnp.dtype(x2d.dtype).itemsize
    m = _cdiv(f, _LANE)
    ts, m_pad = _choose_feature_tile(m)
    feat_steps = m_pad // ts
    limit, budget = _vmem_params()
    per_elem = 4 * itemsize + 4                     # x + y double-buffered + slack
    tn, n_pad = _choose_batch_tile(n, ts, feat_steps, per_elem, budget)
    batch_steps = n_pad // tn
    f_pad = m_pad * _LANE
    x3 = _pad_to_3d(x2d, n_pad, f_pad)
    # cast clip once in the wrapper so the kernel runs entirely in x.dtype
    clip3 = _pad_to_3d(clip2d.astype(x2d.dtype), 1, f_pad).reshape(m_pad, _LANE)

    y3 = pl.pallas_call(
        _eval_kernel,
        out_shape=jax.ShapeDtypeStruct((n_pad, m_pad, _LANE), x2d.dtype),
        grid_spec=pltpu.PrefetchScalarGridSpec(
            num_scalar_prefetch=0,
            grid=(feat_steps, batch_steps),
            in_specs=[
                pl.BlockSpec((tn, ts, _LANE), lambda j, b: (b, j, 0)),
                # clip block only changes with j, so it is not re-DMA'd per batch step
                pl.BlockSpec((ts, _LANE), lambda j, b: (j, 0)),
            ],
            out_specs=pl.BlockSpec((tn, ts, _LANE), lambda j, b: (b, j, 0)),
        ),
        compiler_params=pltpu.CompilerParams(
            dimension_semantics=("parallel", "parallel"),
            vmem_limit_bytes=limit),
    )(x3, clip3)
    return y3.reshape(n_pad, f_pad)[:n, :f]


class RobustActivation:
    """JAX/Pallas port of the PyTorch RobustActivation (activation f = ReLU)."""

    def __init__(self, p=1.0):
        self.p = p
        self.s = None
        self.q = None
        self.N = None
        self.training = True

    def __call__(self, x):
        # x: NCHW (PyTorch conv layout)
        n, c, h, w = x.shape
        x2d = x.reshape(n, c * h * w)
        if self.training:
            y2d, s_new, q_new = robust_activation_train(x2d)
            s_new = s_new.reshape(c, h, w)
            q_new = q_new.reshape(c, h, w)
            if self.s is None:
                self.s, self.q, self.N = s_new, q_new, n
            else:
                # TODO(synk): running-stat accumulation across calls stays as a
                # tiny (C,H,W) JAX add mirroring the PyTorch module attributes.
                self.s = self.s + s_new
                self.q = self.q + q_new
                self.N = self.N + n
            return y2d.reshape(n, c, h, w)
        else:
            if self.s is None or not self.N:
                raise ValueError("RobustActivation: eval before any training pass")
            s2d = self.s.reshape(1, c * h * w).astype(jnp.float32)
            q2d = self.q.reshape(1, c * h * w).astype(jnp.float32)
            n_f = jnp.float32(self.N)
            # clamp FP-rounding negatives so sqrt never produces NaN
            var = jnp.maximum(n_f * q2d - s2d * s2d, 0.0)
            clip2d = (s2d + jnp.float32(self.p) * jnp.sqrt(var)) / n_f
            y2d = robust_activation_eval(x2d, clip2d)
            return y2d.reshape(n, c, h, w)


def _ref_train(x):
    y = jnp.maximum(x, 0.0)
    return y, jnp.sum(y, axis=0), jnp.sum(y * y, axis=0)


def _ref_eval(x, s, q, n, p):
    y = jnp.maximum(x, 0.0)
    clip = (s + p * jnp.sqrt(jnp.maximum(n * q - s * s, 0.0))) / n
    return jnp.minimum(y, clip[None, ...])


if __name__ == "__main__":
    key = jax.random.PRNGKey(0)
    k1, k2, k3 = jax.random.split(key, 3)
    N, C, H, W = 2, 4, 16, 16

    x_a = jax.random.normal(k1, (N, C, H, W), dtype=jnp.float32)
    x_b = jax.random.normal(k2, (N, C, H, W), dtype=jnp.float32)
    x_c = jax.random.normal(k3, (N, C, H, W), dtype=jnp.float32)

    mod = RobustActivation(p=1.0)

    # --- training: two passes accumulate running stats ---
    mod.training = True
    y_a = mod(x_a)
    y_b = mod(x_b)
    jax.block_until_ready((y_a, y_b, mod.s, mod.q))

    # reference stats
    ya_r, sa_r, qa_r = _ref_train(x_a)
    yb_r, sb_r, qb_r = _ref_train(x_b)
    s_ref = sa_r + sb_r
    q_ref = qa_r + qb_r
    n_ref = 2 * N

    assert jnp.allclose(y_a, ya_r, atol=1e-6)
    assert jnp.allclose(y_b, yb_r, atol=1e-6)
    assert jnp.allclose(mod.s, s_ref, atol=1e-5)
    assert jnp.allclose(mod.q, q_ref, atol=1e-5)
    assert mod.N == n_ref

    # --- eval: clip activation with learned per-feature statistics ---
    mod.training = False
    y_c = mod(x_c)
    jax.block_until_ready(y_c)

    y_c_ref = _ref_eval(x_c, s_ref, q_ref, float(n_ref), 1.0)
    assert jnp.allclose(y_c, y_c_ref, atol=1e-5)

    print("KERNEL_OK")
</pallas_src>

<mosaic_0001>
module attributes {stable_mosaic.version = 11 : i64} {
  func.func @_train_kernel(%arg0: i32, %arg1: i32, %arg2: memref<2x8x128xf32, #tpu.memory_space<vmem>>, %arg3: memref<2x8x128xf32, #tpu.memory_space<vmem>>, %arg4: memref<8x128xf32, #tpu.memory_space<vmem>>, %arg5: memref<8x128xf32, #tpu.memory_space<vmem>>) attributes {dimension_semantics = [#tpu.dimension_semantics<parallel>, #tpu.dimension_semantics<arbitrary>], iteration_bounds = array<i64: 1, 1>, scalar_prefetch = 0 : i64, scratch_operands = 0 : i64, tpu.core_type = #tpu.core_type<tc>, window_params = [{transform_indices = @transform_0, window_bounds = array<i64: 2, 8, 128>}, {transform_indices = @transform_1, window_bounds = array<i64: 2, 8, 128>}, {transform_indices = @transform_2, window_bounds = array<i64: 8, 128>}, {transform_indices = @transform_3, window_bounds = array<i64: 8, 128>}]} {
    %c0_i32 = arith.constant 0 : i32
    %0 = arith.cmpi eq, %arg1, %c0_i32 : i32
    %1 = arith.extui %0 : i1 to i32
    %c0_i32_0 = arith.constant 0 : i32
    %2 = arith.cmpi ne, %1, %c0_i32_0 : i32
    scf.if %2 {
      %cst_16 = arith.constant 0.000000e+00 : f32
      %16 = vector.broadcast %cst_16 : f32 to vector<8x128xf32>
      %c0_17 = arith.constant 0 : index
      %c0_18 = arith.constant 0 : index
      %17 = vector.load %arg4[%c0_17, %c0_18] : memref<8x128xf32, #tpu.memory_space<vmem>>, vector<8x128xf32>
      tpu.vector_store %arg4[%c0_17, %c0_18], %16 {strides = array<i32>} : memref<8x128xf32, #tpu.memory_space<vmem>>, vector<8x128xf32>,
      %cst_19 = arith.constant 0.000000e+00 : f32
      %18 = vector.broadcast %cst_19 : f32 to vector<8x128xf32>
      %c0_20 = arith.constant 0 : index
      %c0_21 = arith.constant 0 : index
      %19 = vector.load %arg5[%c0_20, %c0_21] : memref<8x128xf32, #tpu.memory_space<vmem>>, vector<8x128xf32>
      tpu.vector_store %arg5[%c0_20, %c0_21], %18 {strides = array<i32>} : memref<8x128xf32, #tpu.memory_space<vmem>>, vector<8x128xf32>,
    } else {
    }
    %c0 = arith.constant 0 : index
    %c0_1 = arith.constant 0 : index
    %c0_2 = arith.constant 0 : index
    %3 = vector.load %arg2[%c0, %c0_1, %c0_2] : memref<2x8x128xf32, #tpu.memory_space<vmem>>, vector<2x8x128xf32>
    %cst = arith.constant 0.000000e+00 : f32
    %4 = vector.broadcast %cst : f32 to vector<2x8x128xf32>
    %5 = arith.maximumf %3, %4 : vector<2x8x128xf32>
    %c0_3 = arith.constant 0 : index
    %c0_4 = arith.constant 0 : index
    %c0_5 = arith.constant 0 : index
    %6 = vector.load %arg3[%c0_3, %c0_4, %c0_5] : memref<2x8x128xf32, #tpu.memory_space<vmem>>, vector<2x8x128xf32>
    tpu.vector_store %arg3[%c0_3, %c0_4, %c0_5], %5 {strides = array<i32>} : memref<2x8x128xf32, #tpu.memory_space<vmem>>, vector<2x8x128xf32>,
    %c0_6 = arith.constant 0 : index
    %c0_7 = arith.constant 0 : index
    %7 = vector.load %arg4[%c0_6, %c0_7] : memref<8x128xf32, #tpu.memory_space<vmem>>, vector<8x128xf32>
    %cst_8 = arith.constant dense<0.000000e+00> : vector<8x128xf32>
    %8 = vector.multi_reduction <add>, %5, %cst_8 [0] : vector<2x8x128xf32> to vector<8x128xf32>
    %9 = arith.addf %7, %8 : vector<8x128xf32>
    %c0_9 = arith.constant 0 : index
    %c0_10 = arith.constant 0 : index
    %10 = vector.load %arg4[%c0_9, %c0_10] : memref<8x128xf32, #tpu.memory_space<vmem>>, vector<8x128xf32>
    tpu.vector_store %arg4[%c0_9, %c0_10], %9 {strides = array<i32>} : memref<8x128xf32, #tpu.memory_space<vmem>>, vector<8x128xf32>,
    %c0_11 = arith.constant 0 : index
    %c0_12 = arith.constant 0 : index
    %11 = vector.load %arg5[%c0_11, %c0_12] : memref<8x128xf32, #tpu.memory_space<vmem>>, vector<8x128xf32>
    %12 = arith.mulf %5, %5 : vector<2x8x128xf32>
    %cst_13 = arith.constant dense<0.000000e+00> : vector<8x128xf32>
    %13 = vector.multi_reduction <add>, %12, %cst_13 [0] : vector<2x8x128xf32> to vector<8x128xf32>
    %14 = arith.addf %11, %13 : vector<8x128xf32>
    %c0_14 = arith.constant 0 : index
    %c0_15 = arith.constant 0 : index
    %15 = vector.load %arg5[%c0_14, %c0_15] : memref<8x128xf32, #tpu.memory_space<vmem>>, vector<8x128xf32>
    tpu.vector_store %arg5[%c0_14, %c0_15], %14 {strides = array<i32>} : memref<8x128xf32, #tpu.memory_space<vmem>>, vector<8x128xf32>,
    return
  }
  func.func @transform_0(%arg0: i32, %arg1: i32) -> (i32, i32, i32) {
    %c0_i32 = arith.constant 0 : i32
    %c0_i32_0 = arith.constant 0 : i32
    return %arg1, %arg0, %c0_i32 : i32, i32, i32
  }
  func.func @transform_1(%arg0: i32, %arg1: i32) -> (i32, i32, i32) {
    %c0_i32 = arith.constant 0 : i32
    %c0_i32_0 = arith.constant 0 : i32
    return %arg1, %arg0, %c0_i32 : i32, i32, i32
  }
  func.func @transform_2(%arg0: i32, %arg1: i32) -> (i32, i32) {
    %c0_i32 = arith.constant 0 : i32
    %c0_i32_0 = arith.constant 0 : i32
    return %arg0, %c0_i32 : i32, i32
  }
  func.func @transform_3(%arg0: i32, %arg1: i32) -> (i32, i32) {
    %c0_i32 = arith.constant 0 : i32
    %c0_i32_0 = arith.constant 0 : i32
    return %arg0, %c0_i32 : i32, i32
  }
}

</mosaic_0001>

<bundles_post_ra>
// kernel: tpu_custom_call.1
= control target key start
LH: loop header
LB: loop body
LE: loop exit
PB: predicated region body
PF: predicated region fallthrough
CT: control target
= control target key end

     0   :  { %9 = vsyncpa [#allocation3], 0  ;;  %s274_s0 = inlined_call_operand.hbm [shape: f32[2,8,128], index: 0, kind: input, shape index: {}]   ;;  %s275_s1 = inlined_call_operand.hbm [shape: f32[2,8,128], index: 1, kind: output, shape index: {0}]   ;;  %s276_s2 = inlined_call_operand.hbm [shape: f32[8,128], index: 2, kind: output, shape index: {1}]   ;;  %s277_s3 = inlined_call_operand.hbm [shape: f32[8,128], index: 3, kind: output, shape index: {2}]  }
   0x1   :  { %10 = vsyncpa [#allocation4], 0 }
   0x2   :  { %11 = vsyncpa [#allocation7], 0  ;;  %s194_s12 = smov [#allocation2]   ;;  %s100_s16 = scalar_lea.hbm %s274_s0, 256 }
   0x3   :  { %s17_s13 = sshll.u32 %s194_s12, 4  ;;  %p101_p0 = scmp.ne.s32.totalorder %s274_s0, %s100_s16  ;;  %s18_s13 = int_to_ptr.vmem [resolvable:$true] %s17_s13 }
   0x4   :  { %p104_p1 = scmp.lt.u32.totalorder %s100_s16, %s274_s0 }
   0x6   :  { %p106_p2 = pnand %p104_p1, %p101_p0 }
   0x8   :  { %109 = shalt.err (!%p106_p2)
}
   0x9   :  { %s110_s21 = scalar_lea.vmem %s18_s13, 256  ;;  %p115_p4 = scmp.lt.s32.totalorder %s18_s13, %s18_s13 }
   0xa   :  { %p111_p3 = scmp.ne.s32.totalorder %s18_s13, %s110_s21  ;;  %p116_p5 = scmp.lt.s32.totalorder %s110_s21, %s110_s21 }
   0xc   :  { %p117_p6 = por %p116_p5, %p115_p4 }
   0xe   :  { %p118_p7 = pnand %p117_p6, %p111_p3 }
  0x10   :  { %121 = shalt.err (!%p118_p7)
}
  0x11   :  { %s195_s22 = smov 128   ;;  %s196_s23 = smov 8  }
  0x12   :  { %23 = dma.hbm_to_vmem [thread:$0]  %s274_s0, 256, %s18_s13, [#allocation3], %s195_s22, %s195_s22, %s196_s23  }
  0x13   :  { %188 = dma.done.wait [#allocation3], 256  }
  0x14   :  { %189 = vsyncadd [#allocation3], 4294967040  ;;  %s197_s26 = smov [#allocation5]   ;;  %v33_v0 = vld [vmem:[#allocation2] sm:$0xff]  ;;  %v34_v1 = vld [vmem:[#allocation2 + $0x8] sm:$0xff]  ;;  %s198_s28 = smov [#allocation6]  }
  0x15   :  { %s54_s27 = sshll.u32 %s197_s26, 4  ;;  %v35_v2 = vmax.f32 %v33_v0, 0.0  ;;  %v36_v3 = vmax.f32 %v34_v1, 0.0  ;;  %s67_s29 = sshll.u32 %s198_s28, 4  ;;  %s55_s27 = int_to_ptr.vmem [resolvable:$true] %s54_s27  ;;  %s68_s29 = int_to_ptr.vmem [resolvable:$true] %s67_s29 }
  0x16   :  { %s199_s30 = smov [#allocation8]   ;;  %s122_s5 = scalar_lea.vmem %s55_s27, 256 }
  0x17   :  { %v40_v4 = vadd.f32 %v36_v3, %v35_v2  ;;  %37 = vst [vmem:[#allocation5] sm:$0xff] %v35_v2  ;;  %38 = vst [vmem:[#allocation5 + $0x8] sm:$0xff] %v36_v3  ;;  %v44_v5 = vmul.f32 %v35_v2, %v35_v2  ;;  %v45_v6 = vmul.f32 %v36_v3, %v36_v3  ;;  %s77_s4 = sshll.u32 %s199_s30, 4  ;;  %p123_p8 = scmp.ne.s32.totalorder %s55_s27, %s122_s5  ;;  %s78_s4 = int_to_ptr.vmem [resolvable:$true] %s77_s4 }
  0x18   :  { %p127_p9 = scmp.lt.s32.totalorder %s55_s27, %s55_s27  ;;  %p128_p10 = scmp.lt.s32.totalorder %s122_s5, %s122_s5 }
  0x1a   :  { %p129_p11 = por %p128_p10, %p127_p9 }
  0x1c   :  { %p130_p12 = pnand %p129_p11, %p123_p8 }
  0x1e   :  { %133 = shalt.err (!%p130_p12)
}
  0x1f   :  { %s134_s7 = scalar_lea.hbm %s275_s1, 256 }
  0x20   :  { %p135_p13 = scmp.ne.s32.totalorder %s275_s1, %s134_s7  ;;  %p138_p0 = scmp.lt.u32.totalorder %s134_s7, %s275_s1 }
  0x22   :  { %p140_p1 = pnand %p138_p0, %p135_p13 }
  0x24   :  { %143 = shalt.err (!%p140_p1)
}
  0x25   :  { %60 = dma.vmem_to_hbm [thread:$0]  %s55_s27, 256, %s275_s1, [#allocation4], %s195_s22, %s195_s22, %s196_s23   ;;  %v46_v7 = vadd.f32 %v45_v6, %v44_v5  ;;  %42 = vst [vmem:[#allocation6] sm:$0xff] %v40_v4 }
  0x26   :  { %s144_s14 = scalar_lea.vmem %s68_s29, 128  ;;  %p149_p3 = scmp.lt.s32.totalorder %s68_s29, %s68_s29 }
  0x27   :  { %p145_p2 = scmp.ne.s32.totalorder %s68_s29, %s144_s14  ;;  %p150_p4 = scmp.lt.s32.totalorder %s144_s14, %s144_s14 }
  0x29   :  { %p151_p5 = por %p150_p4, %p149_p3 }
  0x2b   :  { %p152_p6 = pnand %p151_p5, %p145_p2 }
  0x2d   :  { %155 = shalt.err (!%p152_p6)
}
  0x2e   :  { %s156_s17 = scalar_lea.hbm %s276_s2, 128 }
  0x2f   :  { %p157_p7 = scmp.ne.s32.totalorder %s276_s2, %s156_s17  ;;  %p160_p8 = scmp.lt.u32.totalorder %s156_s17, %s276_s2 }
  0x31   :  { %p162_p9 = pnand %p160_p8, %p157_p7 }
  0x33   :  { %165 = shalt.err (!%p162_p9)
}
  0x34   :  { %70 = dma.vmem_to_hbm [thread:$0]  %s68_s29, 128, %s276_s2, [#allocation7]   ;;  %48 = vst [vmem:[#allocation8] sm:$0xff] %v46_v7 }
  0x35   :  { %s166_s23 = scalar_lea.vmem %s78_s4, 128  ;;  %p171_p11 = scmp.lt.s32.totalorder %s78_s4, %s78_s4 }
  0x36   :  { %p167_p10 = scmp.ne.s32.totalorder %s78_s4, %s166_s23  ;;  %p172_p12 = scmp.lt.s32.totalorder %s166_s23, %s166_s23 }
  0x38   :  { %p173_p13 = por %p172_p12, %p171_p11 }
  0x3a   :  { %p174_p0 = pnand %p173_p13, %p167_p10 }
  0x3c   :  { %177 = shalt.err (!%p174_p0)
}
  0x3d   :  { %s178_s26 = scalar_lea.hbm %s277_s3, 128 }
  0x3e   :  { %p179_p1 = scmp.ne.s32.totalorder %s277_s3, %s178_s26  ;;  %p182_p2 = scmp.lt.u32.totalorder %s178_s26, %s277_s3 }
  0x40   :  { %p184_p3 = pnand %p182_p2, %p179_p1 }
  0x42   :  { %187 = shalt.err (!%p184_p3)
}
  0x43   :  { %80 = dma.vmem_to_hbm [thread:$0]  %s78_s4, 128, %s277_s3, [#allocation7]  }
  0x44   :  { %190 = dma.done.wait [#allocation4], 256  }
  0x45   :  { %191 = vsyncadd [#allocation4], 4294967040 }
  0x46   :  { %192 = dma.done.wait [#allocation7], 256  }
  0x47   :  { %193 = vsyncadd [#allocation7], 4294967040 }
  0x48   :  { %90 = vsyncpa [#allocation3], 1 }
  0x49   :  { %91 = vsyncpa [#allocation4], 1 }
  0x4a   :  { %92 = vsyncpa [#allocation7], 1 }

</bundles_post_ra>
